<compile_context>
chip_gen: v7x
topology: tpu7x:2x2x1
jax: 0.10.0
libtpu: 0.0.40
codegen_flags: <defaults>
</compile_context>

<pallas_src>
import functools

import jax
import jax.numpy as jnp
from jax.experimental import pallas as pl
from jax.experimental.pallas import tpu as pltpu


def _preprocess_kernel(x_ref, o_ref, *, lo, inv_scale, roi):
    # x_ref : VMEM (TB, H, W)      float32  -- TB batch elements per grid step
    # o_ref : VMEM (TB, 1, rh, rw) float32
    (r0, r1), (c0, c1) = roi
    roi_block = x_ref[:, r0 : r1 + 1, c0 : c1 + 1]
    o_ref[:, 0, :, :] = (roi_block - lo) * inv_scale


def preprocessing_forward(calibrated_pmf, input_range, input_roi):
    """Pallas implementation of PreProcessing.forward.

    calibrated_pmf: (B, H, W) float32
    input_range:    (lo, hi) Python floats (frozen module parameter)
    input_roi:      ((r0, r1), (c0, c1)) Python ints, inclusive (frozen param)
    returns:        (B, 1, roi_h, roi_w) float32
    """
    B, H, W = calibrated_pmf.shape
    (r0, r1), (c0, c1) = input_roi
    rh = r1 + 1 - r0
    rw = c1 + 1 - c0

    lo, hi = float(input_range[0]), float(input_range[1])
    # NOTE: baking lo / inv_scale as constants is valid only because
    # input_range is a frozen (requires_grad=False) parameter. If it ever
    # becomes a traced array, pass it back in as an SMEM scalar operand.
    inv_scale = 1.0 / (hi - lo)

    # Tile the batch axis so each grid step carries substantial work (~4 MiB
    # of input). Double-buffered tiles (2x in + 2x out) stay far below the
    # scoped-VMEM default on every generation (incl. v7x's 64 MiB VMEM).
    bytes_per_batch = H * W * 4
    target_tile_bytes = 4 * 1024 * 1024
    tb = max(1, min(B, target_tile_bytes // max(1, bytes_per_batch)))
    grid = (pl.cdiv(B, tb),)

    kernel = functools.partial(
        _preprocess_kernel, lo=lo, inv_scale=inv_scale, roi=((r0, r1), (c0, c1))
    )

    out = pl.pallas_call(
        kernel,
        out_shape=jax.ShapeDtypeStruct((B, 1, rh, rw), jnp.float32),
        grid=grid,
        in_specs=[
            # TB batch elements per grid step; last two dims are full-extent.
            pl.BlockSpec((tb, H, W), lambda b: (b, 0, 0)),
        ],
        out_specs=pl.BlockSpec((tb, 1, rh, rw), lambda b: (b, 0, 0, 0)),
        compiler_params=pltpu.CompilerParams(
            dimension_semantics=("parallel",)
        ),
    )(calibrated_pmf)
    return out


def _reference_forward(calibrated_pmf, input_range, input_roi):
    lo, hi = input_range
    (r0, r1), (c0, c1) = input_roi
    normalized = (calibrated_pmf - lo) / (hi - lo)
    roi = normalized[..., r0 : r1 + 1, c0 : c1 + 1]
    return roi[:, None, :, :]


if __name__ == "__main__":
    # Deterministic "parameters" (module __init__ arguments).
    input_range = (0.0, 2.5)
    input_roi = ((2, 13), (3, 14))  # inclusive bounds -> ROI is 12x12

    key = jax.random.PRNGKey(0)
    B, H, W = 2, 16, 16
    calibrated_pmf = jax.random.uniform(
        key, (B, H, W), dtype=jnp.float32, minval=0.0, maxval=2.5
    )

    out = preprocessing_forward(calibrated_pmf, input_range, input_roi)
    out = jax.block_until_ready(out)

    ref = _reference_forward(calibrated_pmf, input_range, input_roi)
    assert out.shape == (B, 1, 12, 12), out.shape
    assert jnp.allclose(out, ref, atol=1e-6, rtol=1e-6)

    print("KERNEL_OK")
</pallas_src>

<mosaic_0001>
module attributes {stable_mosaic.version = 11 : i64} {
  func.func @_preprocess_kernel(%arg0: i32, %arg1: memref<2x16x16xf32, #tpu.memory_space<vmem>>, %arg2: memref<2x1x12x12xf32, #tpu.memory_space<vmem>>) attributes {dimension_semantics = [#tpu.dimension_semantics<parallel>], iteration_bounds = array<i64: 1>, scalar_prefetch = 0 : i64, scratch_operands = 0 : i64, tpu.core_type = #tpu.core_type<tc>, window_params = [{transform_indices = @transform_0, window_bounds = array<i64: 2, 16, 16>}, {transform_indices = @transform_1, window_bounds = array<i64: 2, 1, 12, 12>}]} {
    %c0 = arith.constant 0 : index
    %c2 = arith.constant 2 : index
    %c3 = arith.constant 3 : index
    %0 = vector.load %arg1[%c0, %c2, %c3] : memref<2x16x16xf32, #tpu.memory_space<vmem>>, vector<2x12x12xf32>
    %cst = arith.constant 0.000000e+00 : f32
    %1 = vector.broadcast %cst : f32 to vector<2x12x12xf32>
    %2 = arith.subf %0, %1 : vector<2x12x12xf32>
    %cst_0 = arith.constant 4.000000e-01 : f32
    %3 = vector.broadcast %cst_0 : f32 to vector<2x12x12xf32>
    %4 = arith.mulf %2, %3 : vector<2x12x12xf32>
    %c0_1 = arith.constant 0 : index
    %c0_2 = arith.constant 0 : index
    %c0_3 = arith.constant 0 : index
    %c0_4 = arith.constant 0 : index
    %5 = vector.load %arg2[%c0_1, %c0_2, %c0_3, %c0_4] : memref<2x1x12x12xf32, #tpu.memory_space<vmem>>, vector<2x1x12x12xf32>
    %6 = vector.shape_cast %5 : vector<2x1x12x12xf32> to vector<2x12x12xf32>
    %7 = vector.shape_cast %4 : vector<2x12x12xf32> to vector<2x1x12x12xf32>
    tpu.vector_store %arg2[%c0_1, %c0_2, %c0_3, %c0_4], %7 {strides = array<i32>} : memref<2x1x12x12xf32, #tpu.memory_space<vmem>>, vector<2x1x12x12xf32>,
    return
  }
  func.func @transform_0(%arg0: i32) -> (i32, i32, i32) {
    %c0_i32 = arith.constant 0 : i32
    %c0_i32_0 = arith.constant 0 : i32
    %c0_i32_1 = arith.constant 0 : i32
    return %arg0, %c0_i32, %c0_i32_0 : i32, i32, i32
  }
  func.func @transform_1(%arg0: i32) -> (i32, i32, i32, i32) {
    %c0_i32 = arith.constant 0 : i32
    %c0_i32_0 = arith.constant 0 : i32
    %c0_i32_1 = arith.constant 0 : i32
    %c0_i32_2 = arith.constant 0 : i32
    return %arg0, %c0_i32, %c0_i32_0, %c0_i32_1 : i32, i32, i32, i32
  }
}

</mosaic_0001>

<bundles_post_ra>
// kernel: tpu_custom_call.1
= control target key start
LH: loop header
LB: loop body
LE: loop exit
PB: predicated region body
PF: predicated region fallthrough
CT: control target
= control target key end

     0   :  { %6 = vsyncpa [#allocation3], 0  ;;  %s85_s6 = smov [#allocation2]   ;;  %s123_s0 = inlined_call_operand.hbm [shape: f32[2,16,16], index: 0, kind: input, shape index: {}]   ;;  %s124_s1 = inlined_call_operand.vmem [shape: f32[2,1,12,12], index: 1, kind: output, shape index: {}]  }
   0x1   :  { %s12_s7 = sshll.u32 %s85_s6, 4  ;;  %s61_s10 = scalar_lea.hbm %s123_s0, 512  ;;  %s13_s7 = int_to_ptr.vmem [resolvable:$true] %s12_s7 }
   0x2   :  { %p62_p0 = scmp.ne.s32.totalorder %s123_s0, %s61_s10  ;;  %p65_p1 = scmp.lt.u32.totalorder %s61_s10, %s123_s0 }
   0x4   :  { %p67_p2 = pnand %p65_p1, %p62_p0 }
   0x6   :  { %70 = shalt.err (!%p67_p2)
}
   0x7   :  { %s71_s15 = scalar_lea.vmem %s13_s7, 512  ;;  %p76_p4 = scmp.lt.s32.totalorder %s13_s7, %s13_s7 }
   0x8   :  { %p72_p3 = scmp.ne.s32.totalorder %s13_s7, %s71_s15  ;;  %p77_p5 = scmp.lt.s32.totalorder %s71_s15, %s71_s15 }
   0xa   :  { %p78_p6 = por %p77_p5, %p76_p4 }
   0xc   :  { %p79_p7 = pnand %p78_p6, %p72_p3 }
   0xe   :  { %82 = shalt.err (!%p79_p7)
}
   0xf   :  { %s86_s16 = smov 128   ;;  %s87_s17 = smov 8  }
  0x10   :  { %18 = dma.hbm_to_vmem [thread:$0]  %s123_s0, 512, %s13_s7, [#allocation3], %s86_s16, %s86_s16, %s87_s17  }
  0x11   :  { %83 = dma.done.wait [#allocation3], 512  }
  0x12   :  { %84 = vsyncadd [#allocation3], 4294966784  ;;  %v24_v0 = vld [vmem:[#allocation2 + $0x12] sm:$0xff]  ;;  %v22_v1 = vld [vmem:[#allocation2 + $0x2] sm:$0xff]  ;;  %s88_s20 = smov 125   ;;  %vm46_vm0 = vcmask 97280  }
  0x13   :  { %v25_v2 = vld [vmem:[#allocation2 + $0x1a] sm:$0xf]  ;;  %v28_v3 = vmul.f32 0.4, %v24_v0  ;;  %v26_v4 = vmul.f32 0.4, %v22_v1 }
  0x14   :  { %v23_v5 = vld [vmem:[#allocation2 + $0xa] sm:$0xf]  ;;  %v29_v6 = vmul.f32 0.4, %v25_v2  ;;  %vm48_vm1 = vcmask 93184  }
  0x15   :  { %38 = vrot.lane.b32.xlu1 %v28_v3, %s88_s20  ;;  %34 = vrot.lane.b32.xlu0 %v26_v4, %s88_s20  ;;  %v27_v7 = vmul.f32 0.4, %v23_v5 }
  0x19   :  { %40 = vrot.lane.b32.xlu1 %v29_v6, %s88_s20  ;;  %36 = vrot.lane.b32.xlu0 %v27_v7, %s88_s20 }
  0x87   :  { %v39_v8 = vpop.permute.xlu1 %38  ;;  %v35_v9 = vpop.permute.xlu0 %34 }
  0x88   :  { %50 = vst.msk [vmem:[%s124_s1 + $0x10] sm:$0xff] %vm46_vm0, %v39_v8  ;;  %47 = vst.msk [vmem:[%s124_s1] sm:$0xff] %vm46_vm0, %v35_v9 }
  0x8b   :  { %v41_v10 = vpop.permute.xlu1 %40  ;;  %v37_v11 = vpop.permute.xlu0 %36 }
  0x8c   :  { %51 = vst.msk [vmem:[%s124_s1 + $0x18] sm:$0xf] %vm48_vm1, %v41_v10  ;;  %49 = vst.msk [vmem:[%s124_s1 + $0x8] sm:$0xf] %vm48_vm1, %v37_v11 }
  0x8d   :  { %56 = vsyncpa [#allocation3], 1 }

</bundles_post_ra>
